<compile_context>
chip_gen: v6e
topology: v6e:2x2x1
jax: 0.10.0
libtpu: 0.0.40
codegen_flags: <defaults>
</compile_context>

<pallas_src>
import jax
import jax.numpy as jnp
from jax import lax
from jax.experimental import pallas as pl
from jax.experimental.pallas import tpu as pltpu


def _round_up(x, m):
    return (x + m - 1) // m * m


def graphsage_kernel(self_ref, adj_ref, feat_ref, w1s_ref, w1n_ref, b1_ref,
                     w3_ref, b3_ref, out_ref, acc_ref):
    k = pl.program_id(1)

    @pl.when(k == 0)
    def _init():
        acc_ref[...] = jnp.zeros_like(acc_ref)

    # Neighbor-mean aggregation tile: bf16 operands, f32 accumulation on the MXU.
    acc_ref[...] += jnp.dot(adj_ref[...], feat_ref[...],
                            preferred_element_type=jnp.float32)

    @pl.when(k == pl.num_programs(1) - 1)
    def _epilogue():
        means = acc_ref[...].astype(jnp.bfloat16)                     # (TB, D)
        # linear1(concat([self, means], 1)) == self @ W1[:D] + means @ W1[D:] + b1
        emb = (jnp.dot(self_ref[...], w1s_ref[...],
                       preferred_element_type=jnp.float32)
               + jnp.dot(means, w1n_ref[...],
                         preferred_element_type=jnp.float32)
               + b1_ref[...])
        h = jnp.maximum(emb, 0.0).astype(jnp.bfloat16)                # F.relu
        logits = (jnp.dot(h, w3_ref[...],
                          preferred_element_type=jnp.float32)
                  + b3_ref[...])                                      # linear3
        # F.normalize(logits, dim=1): x / max(||x||_2, 1e-12)
        # Exact over the padded Cp columns only because w3 / b3 are zero-padded.
        sumsq = jnp.sum(logits * logits, axis=1, keepdims=True)
        inv = lax.rsqrt(jnp.maximum(sumsq, 1e-24))                    # EUP rsqrt
        out_ref[...] = (logits * inv).astype(out_ref.dtype)


def prepare_graphsage_params(feat_data, w1_self, w1_neigh, b1, w3, b3, *, tv=2048):
    """One-time padding / bf16 cast of the feature table and weights (hoisted
    out of the per-call path so repeated forwards don't re-read V x D in HBM)."""
    V, D = feat_data.shape
    H = w1_self.shape[1]
    C = w3.shape[1]

    TV = min(tv, _round_up(V, 128))
    Vp = _round_up(V, TV)
    # Only the epilogue dims are padded to full 128-lane vregs; D stays native.
    Hp, Cp = _round_up(H, 128), _round_up(C, 128)

    def pad2(x, r, c, dtype):
        x = jnp.pad(x, ((0, r - x.shape[0]), (0, c - x.shape[1])))
        return x.astype(dtype)

    return dict(
        feat=pad2(feat_data, Vp, D, jnp.bfloat16),   # streamed, native D
        w1s=pad2(w1_self, D, Hp, jnp.bfloat16),
        w1n=pad2(w1_neigh, D, Hp, jnp.bfloat16),
        b1=pad2(b1, 1, Hp, jnp.float32),
        w3=pad2(w3, Hp, Cp, jnp.bfloat16),
        b3=pad2(b3, 1, Cp, jnp.float32),
        V=V, D=D, H=H, C=C, TV=TV, Vp=Vp, Hp=Hp, Cp=Cp,
    )


def supervised_graphsage_forward(params, self_feats, adj_norm, *, tb=512):
    # TODO(synk): the original adj_lists is a python dict-of-sets; here the
    # neighbor-mean is a dense row-normalized adjacency matmul.  For genuinely
    # sparse / large-V graphs a PrefetchScalarGridSpec gather (per-node
    # neighbor indices in SMEM + row-gather DMA from a pl.ANY feat ref) would
    # stream ~sum(degree)*D bytes instead of B*V + V*D per batch.
    B = self_feats.shape[0]
    D, C = params["D"], params["C"]
    TV, Vp, Hp, Cp = params["TV"], params["Vp"], params["Hp"], params["Cp"]

    # B tiling.  Large TB also minimizes how often feat_data is re-streamed
    # (index_map (k, 0) re-reads the table once per B-tile).
    TB = min(tb, _round_up(B, 8))
    Bp = _round_up(B, TB)
    if Bp // TB == 1 and Bp >= 16:
        # Ensure >= 2 B-tiles so both v7x TensorCores get work on the
        # "parallel" axis (no-op cost on single-TC v5e/v6e: one extra step).
        TB = _round_up((Bp + 1) // 2, 8)
        Bp = _round_up(B, TB)

    self_p = jnp.pad(self_feats,
                     ((0, Bp - B), (0, 0))).astype(jnp.bfloat16)
    adj_p = jnp.pad(adj_norm,
                    ((0, Bp - B), (0, Vp - adj_norm.shape[1]))).astype(jnp.bfloat16)

    grid = (Bp // TB, Vp // TV)

    flops = 2 * Bp * Vp * D + 2 * Bp * (2 * D * Hp + Hp * Cp)
    bytes_accessed = (adj_p.size * 2                       # adjacency stream
                      + params["feat"].size * 2 * grid[0]  # feat re-streamed per B-tile
                      + self_p.size * 2 + Bp * Cp * 4
                      + (params["w1s"].size + params["w1n"].size
                         + params["w3"].size) * 2
                      + (params["b1"].size + params["b3"].size) * 4)

    # VMEM budget (lane dims pad to 128 inside VMEM even though HBM stays
    # narrow): double-buffered streamed tiles + resident weights + scratch.
    Dv = _round_up(D, 128)
    needed = (2 * (TB * TV * 2 + TV * Dv * 2 + TB * Dv * 2 + TB * Cp * 4)
              + 2 * ((2 * Dv * Hp + Hp * Cp) * 2 + (Hp + Cp) * 4)
              + TB * Dv * 4)
    vmem_limit = min(max(2 * needed + (4 << 20), 32 << 20), 64 << 20)

    # TODO(synk): on v7x with very large D/H, pipeline_mode=pl.Buffered(1) on
    # the constant-index weight specs would halve their resident VMEM.
    out_p = pl.pallas_call(
        graphsage_kernel,
        out_shape=jax.ShapeDtypeStruct((Bp, Cp), jnp.float32),
        grid_spec=pltpu.PrefetchScalarGridSpec(
            num_scalar_prefetch=0,
            grid=grid,
            in_specs=[
                pl.BlockSpec((TB, D), lambda i, k: (i, 0)),    # self feats (native D)
                pl.BlockSpec((TB, TV), lambda i, k: (i, k)),   # adj (streamed)
                pl.BlockSpec((TV, D), lambda i, k: (k, 0)),    # feats (streamed, native D)
                pl.BlockSpec((D, Hp), lambda i, k: (0, 0)),    # w1_self (resident)
                pl.BlockSpec((D, Hp), lambda i, k: (0, 0)),    # w1_neigh (resident)
                pl.BlockSpec((1, Hp), lambda i, k: (0, 0)),    # b1
                pl.BlockSpec((Hp, Cp), lambda i, k: (0, 0)),   # w3
                pl.BlockSpec((1, Cp), lambda i, k: (0, 0)),    # b3
            ],
            out_specs=pl.BlockSpec((TB, Cp), lambda i, k: (i, 0)),
            scratch_shapes=[pltpu.VMEM((TB, D), jnp.float32)],
        ),
        compiler_params=pltpu.CompilerParams(
            dimension_semantics=("parallel", "arbitrary"),
            vmem_limit_bytes=vmem_limit,
        ),
        cost_estimate=pl.CostEstimate(
            flops=flops, transcendentals=Bp, bytes_accessed=bytes_accessed),
    )(self_p, adj_p, params["feat"], params["w1s"], params["w1n"],
      params["b1"], params["w3"], params["b3"])

    return out_p[:B, :C]


if __name__ == "__main__":
    # Small synthetic sizes consistent with the module:
    V, D, H, C, B = 64, 16, 32, 8, 8   # nodes, input_dim, output_dim, n_classes, batch
    key = jax.random.PRNGKey(0)
    ks = jax.random.split(key, 6)

    feat_data = jax.random.normal(ks[0], (V, D), jnp.float32)

    # Dense row-normalized adjacency for the B query nodes (node ids 0..B-1).
    mask = (jax.random.uniform(ks[1], (B, V)) > 0.7).astype(jnp.float32)
    mask = mask.at[jnp.arange(B), jnp.arange(B)].set(1.0)       # >= 1 neighbor
    adj_norm = mask / jnp.sum(mask, axis=1, keepdims=True)      # mean weights
    self_feats = feat_data[:B]                                  # feat_data[nodes]

    # Deterministic nn.Linear-style init (uniform +-1/sqrt(fan_in)), pre-transposed.
    bound1 = 1.0 / jnp.sqrt(2.0 * D)
    w1 = jax.random.uniform(ks[2], (2 * D, H), jnp.float32, -bound1, bound1)
    b1 = jax.random.uniform(ks[3], (1, H), jnp.float32, -bound1, bound1)
    bound3 = 1.0 / jnp.sqrt(float(H))
    w3 = jax.random.uniform(ks[4], (H, C), jnp.float32, -bound3, bound3)
    b3 = jax.random.uniform(ks[5], (1, C), jnp.float32, -bound3, bound3)

    # One-time param prep (padding + bf16 cast hoisted out of the call path).
    params = prepare_graphsage_params(feat_data, w1[:D], w1[D:], b1, w3, b3)

    out = supervised_graphsage_forward(params, self_feats, adj_norm)
    jax.block_until_ready(out)

    # Pure-JAX reference mirroring the kernel's bf16 MXU / f32 accumulation.
    bf = jnp.bfloat16
    means = jnp.dot(adj_norm.astype(bf), feat_data.astype(bf),
                    preferred_element_type=jnp.float32)
    emb = (jnp.dot(self_feats.astype(bf), w1[:D].astype(bf),
                   preferred_element_type=jnp.float32)
           + jnp.dot(means.astype(bf), w1[D:].astype(bf),
                     preferred_element_type=jnp.float32)
           + b1)
    h = jnp.maximum(emb, 0.0).astype(bf)
    logits = jnp.dot(h, w3.astype(bf), preferred_element_type=jnp.float32) + b3
    ref = logits / jnp.maximum(
        jnp.linalg.norm(logits, axis=1, keepdims=True), 1e-12)

    assert out.shape == (B, C) and out.dtype == jnp.float32
    assert jnp.allclose(out, ref, atol=5e-5, rtol=5e-5), (
        float(jnp.max(jnp.abs(out - ref))))
    print("KERNEL_OK")
</pallas_src>

<mosaic_0001>
module attributes {stable_mosaic.version = 11 : i64} {
  func.func @graphsage_kernel(%arg0: i32, %arg1: i32, %arg2: memref<8x16xbf16, #tpu.memory_space<vmem>>, %arg3: memref<8x128xbf16, #tpu.memory_space<vmem>>, %arg4: memref<128x16xbf16, #tpu.memory_space<vmem>>, %arg5: memref<16x128xbf16, #tpu.memory_space<vmem>>, %arg6: memref<16x128xbf16, #tpu.memory_space<vmem>>, %arg7: memref<1x128xf32, #tpu.memory_space<vmem>>, %arg8: memref<128x128xbf16, #tpu.memory_space<vmem>>, %arg9: memref<1x128xf32, #tpu.memory_space<vmem>>, %arg10: memref<8x128xf32, #tpu.memory_space<vmem>>, %arg11: memref<8x16xf32, #tpu.memory_space<vmem>>) attributes {dimension_semantics = [#tpu.dimension_semantics<parallel>, #tpu.dimension_semantics<arbitrary>], iteration_bounds = array<i64: 1, 1>, scalar_prefetch = 0 : i64, scratch_operands = 1 : i64, tpu.core_type = #tpu.core_type<tc>, window_params = [{transform_indices = @transform_0, window_bounds = array<i64: 8, 16>}, {transform_indices = @transform_1, window_bounds = array<i64: 8, 128>}, {transform_indices = @transform_2, window_bounds = array<i64: 128, 16>}, {pipeline_mode = #tpu.pipeline_mode<synchronous>, transform_indices = @transform_3, window_bounds = array<i64: 16, 128>}, {pipeline_mode = #tpu.pipeline_mode<synchronous>, transform_indices = @transform_4, window_bounds = array<i64: 16, 128>}, {pipeline_mode = #tpu.pipeline_mode<synchronous>, transform_indices = @transform_5, window_bounds = array<i64: 1, 128>}, {pipeline_mode = #tpu.pipeline_mode<synchronous>, transform_indices = @transform_6, window_bounds = array<i64: 128, 128>}, {pipeline_mode = #tpu.pipeline_mode<synchronous>, transform_indices = @transform_7, window_bounds = array<i64: 1, 128>}, {transform_indices = @transform_8, window_bounds = array<i64: 8, 128>}]} {
    %c0_i32 = arith.constant 0 : i32
    %0 = arith.cmpi eq, %arg1, %c0_i32 : i32
    %1 = arith.extui %0 : i1 to i32
    %c0_i32_0 = arith.constant 0 : i32
    %2 = arith.cmpi ne, %1, %c0_i32_0 : i32
    scf.if %2 {
      %cst_10 = arith.constant 0.000000e+00 : f32
      %12 = vector.broadcast %cst_10 : f32 to vector<8x16xf32>
      %c0_11 = arith.constant 0 : index
      %c0_12 = arith.constant 0 : index
      %13 = vector.load %arg11[%c0_11, %c0_12] : memref<8x16xf32, #tpu.memory_space<vmem>>, vector<8x16xf32>
      tpu.vector_store %arg11[%c0_11, %c0_12], %12 {strides = array<i32>} : memref<8x16xf32, #tpu.memory_space<vmem>>, vector<8x16xf32>,
    } else {
    }
    %c0 = arith.constant 0 : index
    %c0_1 = arith.constant 0 : index
    %3 = vector.load %arg11[%c0, %c0_1] : memref<8x16xf32, #tpu.memory_space<vmem>>, vector<8x16xf32>
    %c0_2 = arith.constant 0 : index
    %c0_3 = arith.constant 0 : index
    %4 = vector.load %arg3[%c0_2, %c0_3] : memref<8x128xbf16, #tpu.memory_space<vmem>>, vector<8x128xbf16>
    %c0_4 = arith.constant 0 : index
    %c0_5 = arith.constant 0 : index
    %5 = vector.load %arg4[%c0_4, %c0_5] : memref<128x16xbf16, #tpu.memory_space<vmem>>, vector<128x16xbf16>
    %cst = arith.constant dense<0.000000e+00> : vector<8x16xf32>
    %6 = tpu.matmul %4, %5, %cst {dimension_numbers = #tpu.dot_dimension_numbers<[1], [0], [0], [1], [0, 0, 1, 1], [], []>} : vector<8x128xbf16>, vector<128x16xbf16>, vector<8x16xf32> -> vector<8x16xf32>
    %7 = arith.addf %3, %6 : vector<8x16xf32>
    %c0_6 = arith.constant 0 : index
    %c0_7 = arith.constant 0 : index
    %8 = vector.load %arg11[%c0_6, %c0_7] : memref<8x16xf32, #tpu.memory_space<vmem>>, vector<8x16xf32>
    tpu.vector_store %arg11[%c0_6, %c0_7], %7 {strides = array<i32>} : memref<8x16xf32, #tpu.memory_space<vmem>>, vector<8x16xf32>,
    %c0_i32_8 = arith.constant 0 : i32
    %9 = arith.cmpi eq, %arg1, %c0_i32_8 : i32
    %10 = arith.extui %9 : i1 to i32
    %c0_i32_9 = arith.constant 0 : i32
    %11 = arith.cmpi ne, %10, %c0_i32_9 : i32
    scf.if %11 {
      %c0_10 = arith.constant 0 : index
      %c0_11 = arith.constant 0 : index
      %12 = vector.load %arg11[%c0_10, %c0_11] : memref<8x16xf32, #tpu.memory_space<vmem>>, vector<8x16xf32>
      %13 = arith.truncf %12 : vector<8x16xf32> to vector<8x16xbf16>
      %c0_12 = arith.constant 0 : index
      %c0_13 = arith.constant 0 : index
      %14 = vector.load %arg2[%c0_12, %c0_13] : memref<8x16xbf16, #tpu.memory_space<vmem>>, vector<8x16xbf16>
      %c0_14 = arith.constant 0 : index
      %c0_15 = arith.constant 0 : index
      %15 = vector.load %arg5[%c0_14, %c0_15] : memref<16x128xbf16, #tpu.memory_space<vmem>>, vector<16x128xbf16>
      %cst_16 = arith.constant dense<0.000000e+00> : vector<8x128xf32>
      %16 = tpu.matmul %14, %15, %cst_16 {dimension_numbers = #tpu.dot_dimension_numbers<[1], [0], [0], [1], [0, 0, 1, 1], [], []>} : vector<8x16xbf16>, vector<16x128xbf16>, vector<8x128xf32> -> vector<8x128xf32>
      %c0_17 = arith.constant 0 : index
      %c0_18 = arith.constant 0 : index
      %17 = vector.load %arg6[%c0_17, %c0_18] : memref<16x128xbf16, #tpu.memory_space<vmem>>, vector<16x128xbf16>
      %cst_19 = arith.constant dense<0.000000e+00> : vector<8x128xf32>
      %18 = tpu.matmul %13, %17, %cst_19 {dimension_numbers = #tpu.dot_dimension_numbers<[1], [0], [0], [1], [0, 0, 1, 1], [], []>} : vector<8x16xbf16>, vector<16x128xbf16>, vector<8x128xf32> -> vector<8x128xf32>
      %19 = arith.addf %16, %18 : vector<8x128xf32>
      %c0_20 = arith.constant 0 : index
      %c0_21 = arith.constant 0 : index
      %20 = vector.load %arg7[%c0_20, %c0_21] : memref<1x128xf32, #tpu.memory_space<vmem>>, vector<1x128xf32>
      %21 = vector.broadcast %20 : vector<1x128xf32> to vector<8x128xf32>
      %22 = arith.addf %19, %21 : vector<8x128xf32>
      %cst_22 = arith.constant 0.000000e+00 : f32
      %23 = vector.broadcast %cst_22 : f32 to vector<8x128xf32>
      %24 = arith.maximumf %22, %23 : vector<8x128xf32>
      %25 = arith.truncf %24 : vector<8x128xf32> to vector<8x128xbf16>
      %c0_23 = arith.constant 0 : index
      %c0_24 = arith.constant 0 : index
      %26 = vector.load %arg8[%c0_23, %c0_24] : memref<128x128xbf16, #tpu.memory_space<vmem>>, vector<128x128xbf16>
      %cst_25 = arith.constant dense<0.000000e+00> : vector<8x128xf32>
      %27 = tpu.matmul %25, %26, %cst_25 {dimension_numbers = #tpu.dot_dimension_numbers<[1], [0], [0], [1], [0, 0, 1, 1], [], []>} : vector<8x128xbf16>, vector<128x128xbf16>, vector<8x128xf32> -> vector<8x128xf32>
      %c0_26 = arith.constant 0 : index
      %c0_27 = arith.constant 0 : index
      %28 = vector.load %arg9[%c0_26, %c0_27] : memref<1x128xf32, #tpu.memory_space<vmem>>, vector<1x128xf32>
      %29 = vector.broadcast %28 : vector<1x128xf32> to vector<8x128xf32>
      %30 = arith.addf %27, %29 : vector<8x128xf32>
      %31 = arith.mulf %30, %30 : vector<8x128xf32>
      %cst_28 = arith.constant dense<0.000000e+00> : vector<8xf32>
      %32 = vector.multi_reduction <add>, %31, %cst_28 [1] : vector<8x128xf32> to vector<8xf32>
      %33 = vector.shape_cast %32 : vector<8xf32> to vector<8x1xf32>
      %cst_29 = arith.constant 1.000000e-24 : f32
      %34 = vector.broadcast %cst_29 : f32 to vector<8x1xf32>
      %35 = arith.maximumf %33, %34 : vector<8x1xf32>
      %36 = math.rsqrt %35 : vector<8x1xf32>
      %37 = vector.broadcast %36 : vector<8x1xf32> to vector<8x128xf32>
      %38 = arith.mulf %30, %37 : vector<8x128xf32>
      %c0_30 = arith.constant 0 : index
      %c0_31 = arith.constant 0 : index
      %39 = vector.load %arg10[%c0_30, %c0_31] : memref<8x128xf32, #tpu.memory_space<vmem>>, vector<8x128xf32>
      tpu.vector_store %arg10[%c0_30, %c0_31], %38 {strides = array<i32>} : memref<8x128xf32, #tpu.memory_space<vmem>>, vector<8x128xf32>,
    } else {
    }
    return
  }
  func.func @transform_0(%arg0: i32, %arg1: i32) -> (i32, i32) {
    %c0_i32 = arith.constant 0 : i32
    %c0_i32_0 = arith.constant 0 : i32
    return %arg0, %c0_i32 : i32, i32
  }
  func.func @transform_1(%arg0: i32, %arg1: i32) -> (i32, i32) {
    %c0_i32 = arith.constant 0 : i32
    return %arg0, %arg1 : i32, i32
  }
  func.func @transform_2(%arg0: i32, %arg1: i32) -> (i32, i32) {
    %c0_i32 = arith.constant 0 : i32
    %c0_i32_0 = arith.constant 0 : i32
    return %arg1, %c0_i32 : i32, i32
  }
  func.func @transform_3(%arg0: i32, %arg1: i32) -> (i32, i32) {
    %c0_i32 = arith.constant 0 : i32
    %c0_i32_0 = arith.constant 0 : i32
    %c0_i32_1 = arith.constant 0 : i32
    return %c0_i32, %c0_i32_0 : i32, i32
  }
  func.func @transform_4(%arg0: i32, %arg1: i32) -> (i32, i32) {
    %c0_i32 = arith.constant 0 : i32
    %c0_i32_0 = arith.constant 0 : i32
    %c0_i32_1 = arith.constant 0 : i32
    return %c0_i32, %c0_i32_0 : i32, i32
  }
  func.func @transform_5(%arg0: i32, %arg1: i32) -> (i32, i32) {
    %c0_i32 = arith.constant 0 : i32
    %c0_i32_0 = arith.constant 0 : i32
    %c0_i32_1 = arith.constant 0 : i32
    return %c0_i32, %c0_i32_0 : i32, i32
  }
  func.func @transform_6(%arg0: i32, %arg1: i32) -> (i32, i32) {
    %c0_i32 = arith.constant 0 : i32
    %c0_i32_0 = arith.constant 0 : i32
    %c0_i32_1 = arith.constant 0 : i32
    return %c0_i32, %c0_i32_0 : i32, i32
  }
  func.func @transform_7(%arg0: i32, %arg1: i32) -> (i32, i32) {
    %c0_i32 = arith.constant 0 : i32
    %c0_i32_0 = arith.constant 0 : i32
    %c0_i32_1 = arith.constant 0 : i32
    return %c0_i32, %c0_i32_0 : i32, i32
  }
  func.func @transform_8(%arg0: i32, %arg1: i32) -> (i32, i32) {
    %c0_i32 = arith.constant 0 : i32
    %c0_i32_0 = arith.constant 0 : i32
    return %arg0, %c0_i32 : i32, i32
  }
}

</mosaic_0001>

<bundles_post_ra>
// kernel: tpu_custom_call.1
= control target key start
LH: loop header
LB: loop body
LE: loop exit
PB: predicated region body
PF: predicated region fallthrough
CT: control target
= control target key end

     0   :  { %13 = vsyncpa [#allocation4], 0  ;;  %s759_s0 = inlined_call_operand.hbm [shape: bf16[8,16], index: 0, kind: input, shape index: {}]   ;;  %s760_s1 = inlined_call_operand.hbm [shape: bf16[8,128], index: 1, kind: input, shape index: {}]   ;;  %s761_s2 = inlined_call_operand.vmem [shape: bf16[128,16], index: 2, kind: input, shape index: {}]   ;;  %s762_s3 = inlined_call_operand.vmem [shape: bf16[16,128], index: 3, kind: input, shape index: {}]   ;;  %s763_s4 = inlined_call_operand.vmem [shape: bf16[16,128], index: 4, kind: input, shape index: {}]   ;;  %s764_s5 = inlined_call_operand.vmem [shape: f32[1,128], index: 5, kind: input, shape index: {}]   ;;  %s765_s6 = inlined_call_operand.vmem [shape: bf16[128,128], index: 6, kind: input, shape index: {}]   ;;  %s766_s7 = inlined_call_operand.vmem [shape: f32[1,128], index: 7, kind: input, shape index: {}]   ;;  %s767_s8 = inlined_call_operand.hbm [shape: f32[8,128], index: 8, kind: output, shape index: {}]  }
   0x1   :  { %14 = vsyncpa [#allocation7], 0 }
   0x2   :  { %15 = vsyncpa [#allocation5], 0  ;;  %s609_s27 = smov [#allocation3]   ;;  %s610_s29 = smov [#allocation6]  }
   0x3   :  { %s22_s28 = sshll.u32 %s609_s27, 4  ;;  %s32_s30 = sshll.u32 %s610_s29, 4  ;;  %s23_s28 = int_to_ptr.vmem [resolvable:$true] %s22_s28  ;;  %s33_s30 = int_to_ptr.vmem [resolvable:$true] %s32_s30 }
   0x4   :  { %s551_s9 = scalar_lea.vmem %s23_s28, 64  ;;  %p556_p1 = scmp.lt.s32.totalorder %s23_s28, %s23_s28 }
   0x5   :  { %p552_p0 = scmp.ne.s32.totalorder %s23_s28, %s551_s9  ;;  %p557_p2 = scmp.lt.s32.totalorder %s551_s9, %s551_s9 }
   0x7   :  { %p558_p3 = por %p557_p2, %p556_p1 }
   0x9   :  { %p559_p4 = pnand %p558_p3, %p552_p0 }
   0xb   :  { %562 = shalt.err (!%p559_p4)
}
   0xc   :  { %25 = dma.hbm_to_vmem [thread:$0]  %s759_s0, 64, %s23_s28, [#allocation4]  }
   0xd   :  { %s571_s12 = scalar_lea.vmem %s33_s30, 64  ;;  %p576_p6 = scmp.lt.s32.totalorder %s33_s30, %s33_s30 }
   0xe   :  { %p572_p5 = scmp.ne.s32.totalorder %s33_s30, %s571_s12  ;;  %p577_p7 = scmp.lt.s32.totalorder %s571_s12, %s571_s12 }
  0x10   :  { %p578_p8 = por %p577_p7, %p576_p6 }
  0x12   :  { %p579_p9 = pnand %p578_p8, %p572_p5 }
  0x14   :  { %582 = shalt.err (!%p579_p9)
}
  0x15   :  { %35 = dma.hbm_to_vmem [thread:$0]  %s760_s1, 64, %s33_s30, [#allocation7]  }
  0x16   :  { %603 = dma.done.wait [#allocation4], 64  }
  0x17   :  { %604 = vsyncadd [#allocation4], 4294967232 }
  0x18   :  { %605 = dma.done.wait [#allocation7], 64  }
  0x19   :  { %606 = vsyncadd [#allocation7], 4294967232  ;;  %vm59_vm0 = vcmask 130048   ;;  %v611_v0 = vmov 0.0   ;;  %vm612_vm1 = vmmov 0   ;;  %v523_v1 = vld [vmem:[%s761_s2 + $0x38] sm:$0xff]  }
  0x1a   :  { %466 = vmatprep.subr.bf16.mxu0 %v611_v0  ;;  %482 = vmatprep.mubr.msk.bf16.mxu0 %vm612_vm1, %v611_v0  ;;  %60 = vst.msk [vmem:[#allocation2] sm:$0xff] %vm59_vm0, %v611_v0  ;;  %v524_v2 = vld [vmem:[%s761_s2 + $0x30] sm:$0xff]   ;;  %v525_v3 = vld [vmem:[%s761_s2 + $0x28] sm:$0xff]   ;;  %v526_v4 = vld [vmem:[%s761_s2 + $0x20] sm:$0xff]  }
  0x1b   :  { %492 = vmatprep.subr.bf16.mxu1 %v611_v0  ;;  %494 = vmatprep.mubr.msk.bf16.mxu1 %vm612_vm1, %v611_v0  ;;  %v527_v5 = vld [vmem:[%s761_s2 + $0x18] sm:$0xff]   ;;  %v528_v6 = vld [vmem:[%s761_s2 + $0x10] sm:$0xff]   ;;  %v529_v7 = vld [vmem:[%s761_s2 + $0x8] sm:$0xff]  }
  0x1c   :  { %467 = vmatpush3.bf16.msra.mxu0 %v523_v1  ;;  %v530_v8 = vld [vmem:[%s761_s2] sm:$0xff]   ;;  %v62_v9 = vld [vmem:[#allocation6] sm:$0xf]  ;;  %v175_v12 = vld [vmem:[#allocation3] sm:$0xf] }
  0x1d   :  { %468 = vmatprep.subr.bf16.mxu0 %v611_v0  ;;  %v531_v10 = vld [vmem:[%s762_s3] sm:$0xff]   ;;  %v533_v13 = vld [vmem:[%s765_s6 + $0x38] sm:$0xff]   ;;  %v534_v14 = vld [vmem:[%s765_s6 + $0x30] sm:$0xff]  }
  0x1e   :  { %493 = vmatpush3.bf16.msra.mxu1 %v531_v10  ;;  %v532_v11 = vld [vmem:[%s763_s4] sm:$0xff]   ;;  %v535_v15 = vld [vmem:[%s765_s6 + $0x28] sm:$0xff]   ;;  %v537_v17 = vld [vmem:[%s765_s6 + $0x18] sm:$0xff]  }
  0x1f   :  { %498 = vmatprep.subr.bf16.mxu1 %v611_v0  ;;  %v536_v16 = vld [vmem:[%s765_s6 + $0x20] sm:$0xff]   ;;  %v538_v18 = vld [vmem:[%s765_s6 + $0x10] sm:$0xff]   ;;  %v539_v31 = vld [vmem:[%s765_s6 + $0x8] sm:$0xff]  }
  0x20   :  { %469 = vmatpush3.bf16.msra.mxu0 %v524_v2  ;;  %v540_v32 = vld [vmem:[%s765_s6] sm:$0xff]  }
  0x21   :  { %470 = vmatprep.subr.bf16.mxu0 %v611_v0  ;;  %495 = vmatmul.mubr.msk.bf16.vlgmr.msra.gmra.mxu1 %vm59_vm0, %v175_v12  ;;  %v61_v19 = vld [vmem:[#allocation2] sm:$0xff] }
  0x22   :  { %514 = vmatprep.mubr.msk.bf16.mxu1 %vm612_vm1, %v611_v0  ;;  %499 = vmatpush3.bf16.msra.mxu1 %v533_v13  ;;  %v434_v34 = vld [vmem:[%s764_s5] ss:$0 sm:$0xff]  ;;  %s613_s5 = smov [#allocation8]  }
  0x23   :  { %500 = vmatprep.subr.bf16.mxu1 %v611_v0  ;;  %v435_v42 = vld [vmem:[%s766_s7] ss:$0 sm:$0xff]  ;;  %s412_s6 = sshll.u32 %s613_s5, 4  ;;  %s413_s6 = int_to_ptr.vmem [resolvable:$true] %s412_s6 }
  0x24   :  { %471 = vmatpush3.bf16.msra.mxu0 %v525_v3  ;;  %s583_s26 = scalar_lea.vmem %s413_s6, 128  ;;  %p588_p11 = scmp.lt.s32.totalorder %s413_s6, %s413_s6 }
  0x25   :  { %472 = vmatprep.subr.bf16.mxu0 %v611_v0  ;;  %p584_p10 = scmp.ne.s32.totalorder %s413_s6, %s583_s26  ;;  %p589_p12 = scmp.lt.s32.totalorder %s583_s26, %s583_s26 }
  0x26   :  { %501 = vmatpush3.bf16.msra.mxu1 %v534_v14 }
  0x27   :  { %502 = vmatprep.subr.bf16.mxu1 %v611_v0  ;;  %p590_p13 = por %p589_p12, %p588_p11 }
  0x28   :  { %473 = vmatpush3.bf16.msra.mxu0 %v526_v4 }
  0x29   :  { %474 = vmatprep.subr.bf16.mxu0 %v611_v0  ;;  %p591_p0 = pnand %p590_p13, %p584_p10 }
  0x2a   :  { %503 = vmatpush3.bf16.msra.mxu1 %v535_v15 }
  0x2b   :  { %504 = vmatprep.subr.bf16.mxu1 %v611_v0 }
  0x2c   :  { %475 = vmatpush3.bf16.msra.mxu0 %v527_v5 }
  0x2d   :  { %476 = vmatprep.subr.bf16.mxu0 %v611_v0 }
  0x2e   :  { %505 = vmatpush3.bf16.msra.mxu1 %v536_v16 }
  0x2f   :  { %506 = vmatprep.subr.bf16.mxu1 %v611_v0 }
  0x30   :  { %477 = vmatpush3.bf16.msra.mxu0 %v528_v6 }
  0x31   :  { %478 = vmatprep.subr.bf16.mxu0 %v611_v0 }
  0x32   :  { %507 = vmatpush3.bf16.msra.mxu1 %v537_v17 }
  0x33   :  { %508 = vmatprep.subr.bf16.mxu1 %v611_v0 }
  0x34   :  { %479 = vmatpush3.bf16.msra.mxu0 %v529_v7 }
  0x35   :  { %480 = vmatprep.subr.bf16.mxu0 %v611_v0 }
  0x36   :  { %509 = vmatpush3.bf16.msra.mxu1 %v538_v18 }
  0x37   :  { %510 = vmatprep.subr.bf16.mxu1 %v611_v0 }
  0x38   :  { %481 = vmatpush3.bf16.msra.mxu0 %v530_v8 }
  0x39   :  { %486 = vmatprep.subr.bf16.mxu0 %v611_v0 }
  0x3a   :  { %511 = vmatpush3.bf16.msra.mxu1 %v539_v31 }
  0x3b   :  { %483 = vmatmul.mubr.bf16.vlgmr.msra.gmra.mxu0 %v62_v9  ;;  %512 = vmatprep.subr.bf16.mxu1 %v611_v0 }
  0x3c   :  { %488 = vmatprep.mubr.msk.bf16.mxu0 %vm612_vm1, %v611_v0  ;;  %487 = vmatpush3.bf16.msra.mxu0 %v532_v11 }
  0x3e   :  { %513 = vmatpush3.bf16.msra.mxu1 %v540_v32 }
  0xe1   :  { %v272_v27 = vpop.f32.mrf.mxu1 }
  0xe3   :  { %v496_v28 = vpop.f32.mrf.mxu1 }
  0xe5   :  { %v275_v29 = vpop.f32.mrf.mxu1 }
  0xe7   :  { %v497_v30 = vpop.f32.mrf.mxu1 }
  0xfb   :  { %v161_v20 = vpop.f32.mrf.mxu0 }
  0xfc   :  { %v167_v21 = vadd.f32 %v161_v20, %v61_v19 }
  0xfd   :  { %v484_v22 = vpop.f32.mrf.mxu0 }
  0xfe   :  { %169 = vst.msk [vmem:[#allocation2] sm:$0xff] %vm59_vm0, %v167_v21 }
  0xff   :  { %v164_v23 = vpop.f32.mrf.mxu0 }
 0x101   :  { %v485_v24 = vpop.f32.mrf.mxu0 }
 0x105   :  { %v173_v25 = vld [vmem:[#allocation2] sm:$0xff] }
 0x106   :  { %v174_v26 = vpack.c.bf16 %v173_v25, %v173_v25 }
 0x108   :  { %489 = vmatmul.mubr.msk.bf16.vlgmr.msra.gmra.mxu0 %vm59_vm0, %v174_v26 }
 0x1c8   :  { %v223_v33 = vpop.f32.mrf.mxu0 }
 0x1c9   :  { %v273_v35 = vadd.f32 %v272_v27, %v223_v33 }
 0x1ca   :  { %v490_v36 = vpop.f32.mrf.mxu0 }
 0x1cb   :  { %v285_v37 = vadd.f32 %v434_v34, %v273_v35 }
 0x1cc   :  { %v226_v38 = vpop.f32.mrf.mxu0 }
 0x1cd   :  { %v286_v39 = vmax.f32 %v285_v37, 0.0 }
 0x1ce   :  { %v491_v40 = vpop.f32.mrf.mxu0 }
 0x1cf   :  { %v287_v41 = vpack.c.bf16 %v286_v39, %v286_v39 }
 0x1d1   :  { %515 = vmatmul.mubr.bf16.vlgmr.msra.gmra.mxu1 %v287_v41 }
 0x291   :  { %v393_v43 = vpop.f32.mrf.mxu1 }
 0x292   :  { %v394_v44 = vadd.f32 %v435_v42, %v393_v43 }
 0x293   :  { %v516_v45 = vpop.f32.mrf.mxu1 }
 0x294   :  { %v399_v46 = vmul.f32 %v394_v44, %v394_v44 }
 0x295   :  { %v396_v47 = vpop.f32.mrf.mxu1 }
 0x296   :  { %400 = vadd.xlane.f32.xlu0 %v399_v46 }
 0x297   :  { %v517_v48 = vpop.f32.mrf.mxu1 }
 0x31f   :  { %v401_v49 = vpop.xlane.xlu0 %400 }
 0x320   :  { %v402_v50 = vmax.f32 %v401_v49, 1e-24 }
 0x322   :  { %541 = vrsqrt.f32 %v402_v50 }
 0x32f   :  { %v542_v51 = vpop.eup %541 }
 0x330   :  { %v404_v52 = vmul.f32 %v542_v51, %v394_v44 }
 0x332   :  { %405 = vst [vmem:[#allocation8] sm:$0xff] %v404_v52 }
 0x333   :  { %594 = shalt.err (!%p591_p0)
}
 0x334   :  { %415 = dma.vmem_to_hbm [thread:$0]  %s413_s6, 128, %s767_s8, [#allocation5]  }
 0x335   :  { %607 = dma.done.wait [#allocation5], 128  }
 0x336   :  { %608 = vsyncadd [#allocation5], 4294967168 }
 0x337   :  { %419 = vsyncpa [#allocation4], 1 }
 0x338   :  { %420 = vsyncpa [#allocation7], 1 }
 0x339   :  { %421 = vsyncpa [#allocation5], 1 }

</bundles_post_ra>
